<compile_context>
chip_gen: v7x
topology: tpu7x:2x2x1
jax: 0.10.0
libtpu: 0.0.40
codegen_flags: <defaults>
</compile_context>

<pallas_src>
import functools

import jax
import jax.numpy as jnp
from jax.experimental import pallas as pl
from jax.experimental.pallas import tpu as pltpu


def _round_up(a: int, b: int) -> int:
    return ((a + b - 1) // b) * b


def gru_cell_kernel(x_ref, h_ref, wi_ref, wh_ref, bi_ref, bh_ref, out_ref):
    """One grid step = TILE_M rows (flattened (B, N) positions).

    x_ref  : VMEM f32[TILE_M, Din]     input features for this tile
    h_ref  : VMEM f32[TILE_M, H]       previous hidden state for this tile
    wi_ref : VMEM f32[3, Din, H]       weight_ih^T, split per gate (r, z, n)
    wh_ref : VMEM f32[3, H, H]         weight_hh^T, split per gate (r, z, n)
    bi_ref : VMEM f32[3, 1, H]         bias_ih per gate
    bh_ref : VMEM f32[3, 1, H]         bias_hh per gate
    out_ref: VMEM f32[TILE_M, H]       new hidden state
    """
    x = x_ref[...]
    h = h_ref[...].astype(jnp.float32)

    # Six small MXU dots (per-gate) keep every intermediate in its native lane
    # layout (no lane-axis concat/slice relayout through the XLU).
    gi_r = jnp.dot(x, wi_ref[0], preferred_element_type=jnp.float32)
    gi_z = jnp.dot(x, wi_ref[1], preferred_element_type=jnp.float32)
    gi_n = jnp.dot(x, wi_ref[2], preferred_element_type=jnp.float32)
    gh_r = jnp.dot(h, wh_ref[0], preferred_element_type=jnp.float32)
    gh_z = jnp.dot(h, wh_ref[1], preferred_element_type=jnp.float32)
    gh_n = jnp.dot(h, wh_ref[2], preferred_element_type=jnp.float32)

    r = jax.nn.sigmoid(gi_r + gh_r + bi_ref[0] + bh_ref[0])   # (TILE_M, H)
    z = jax.nn.sigmoid(gi_z + gh_z + bi_ref[1] + bh_ref[1])   # (TILE_M, H)
    n = jnp.tanh(gi_n + bi_ref[2] + r * (gh_n + bh_ref[2]))   # (TILE_M, H)

    h_new = (1.0 - z) * n + z * h
    out_ref[...] = h_new.astype(out_ref.dtype)


@functools.partial(jax.jit, static_argnames=("tile_m",))
def gru_forward(x, y, w_ih, w_hh, b_ih, b_hh, *, tile_m=256):
    """Single-step GRU, matching GRU.forward(x, y) of the PyTorch module.

    x     : (B, N, Din)   input features  (Din <= input_size, zero-padded here)
    y     : (B, N, Dh)    previous hidden (Dh  <= hidden_size, zero-padded here)
    w_ih  : (3H, input_size)   PyTorch nn.GRU weight_ih_l0 (gate order r, z, n)
    w_hh  : (3H, H)            PyTorch nn.GRU weight_hh_l0
    b_ih  : (3H,), b_hh : (3H,)
    returns (B, N, H) new hidden state.
    """
    B, N, Din = x.shape
    input_size = w_ih.shape[1]
    H = w_hh.shape[1]
    Dh = y.shape[-1]
    assert Din <= input_size and Dh <= H

    # Mirror the module's "difference is padded" contract.
    if Din < input_size:
        x = jnp.pad(x, ((0, 0), (0, 0), (0, input_size - Din)))
    if Dh < H:
        y = jnp.pad(y, ((0, 0), (0, 0), (0, H - Dh)))

    M = B * N
    x2 = x.reshape(M, input_size).astype(jnp.float32)
    h2 = y.reshape(M, H).astype(jnp.float32)

    # Batch many rows per grid step (default 256 fills the v6e MXU M dim;
    # a 256 x 32 f32 block is only ~32 KB per buffer, far under the 32 MiB
    # default-scoped VMEM on any generation, double-buffering included).
    tile_m = min(tile_m, _round_up(M, 8))
    m_pad = _round_up(M, tile_m)
    if m_pad != M:
        x2 = jnp.pad(x2, ((0, m_pad - M), (0, 0)))
        h2 = jnp.pad(h2, ((0, m_pad - M), (0, 0)))

    # Pre-transpose and split per gate: (3, input_size, H) / (3, H, H).
    wi_t = jnp.stack([w_ih[0:H].T, w_ih[H:2 * H].T, w_ih[2 * H:].T]).astype(jnp.float32)
    wh_t = jnp.stack([w_hh[0:H].T, w_hh[H:2 * H].T, w_hh[2 * H:].T]).astype(jnp.float32)
    bi = b_ih.reshape(3, 1, H).astype(jnp.float32)
    bh = b_hh.reshape(3, 1, H).astype(jnp.float32)

    grid = (m_pad // tile_m,)
    out = pl.pallas_call(
        gru_cell_kernel,
        out_shape=jax.ShapeDtypeStruct((m_pad, H), jnp.float32),
        grid_spec=pltpu.PrefetchScalarGridSpec(
            num_scalar_prefetch=0,
            grid=grid,
            in_specs=[
                pl.BlockSpec((tile_m, input_size), lambda i: (i, 0)),
                pl.BlockSpec((tile_m, H), lambda i: (i, 0)),
                # Constant block index -> weights/biases stay resident in VMEM.
                pl.BlockSpec((3, input_size, H), lambda i: (0, 0, 0)),
                pl.BlockSpec((3, H, H), lambda i: (0, 0, 0)),
                pl.BlockSpec((3, 1, H), lambda i: (0, 0, 0)),
                pl.BlockSpec((3, 1, H), lambda i: (0, 0, 0)),
            ],
            out_specs=pl.BlockSpec((tile_m, H), lambda i: (i, 0)),
        ),
        compiler_params=pltpu.CompilerParams(
            # Independent rows -> megacore / multi-TC sharding of grid steps.
            dimension_semantics=("parallel",),
        ),
    )(x2, h2, wi_t, wh_t, bi, bh)

    # TODO(synk): if H stays << 128 at production sizes, a wrapper-side
    # reshape to a lane-dense (M*H/128, 128) output slab would remove the
    # masked vst's entirely.
    return out[:M].reshape(B, N, H)


def gru_reference(x, y, w_ih, w_hh, b_ih, b_hh):
    """Pure-JAX single-step GRU matching torch.nn.GRU semantics."""
    B, N, _ = x.shape
    H = w_hh.shape[1]
    xm = x.reshape(B * N, -1)
    hm = y.reshape(B * N, -1)
    gi = xm @ w_ih.T + b_ih            # (M, 3H)
    gh = hm @ w_hh.T + b_hh            # (M, 3H)
    i_r, i_z, i_n = gi[:, :H], gi[:, H:2 * H], gi[:, 2 * H:]
    h_r, h_z, h_n = gh[:, :H], gh[:, H:2 * H], gh[:, 2 * H:]
    r = jax.nn.sigmoid(i_r + h_r)
    z = jax.nn.sigmoid(i_z + h_z)
    n = jnp.tanh(i_n + r * h_n)
    h_new = (1.0 - z) * n + z * hm
    return h_new.reshape(B, N, H)


if __name__ == "__main__":
    key = jax.random.PRNGKey(0)
    B, N = 2, 8                       # batch of 2 graphs, 8 nodes each
    input_size, hidden_size = 32, 32  # GRU(input_size=32, hidden_size=32)
    k1, k2, k3, k4, k5, k6 = jax.random.split(key, 6)

    x = jax.random.normal(k1, (B, N, input_size), dtype=jnp.float32)
    y = jax.random.normal(k2, (B, N, hidden_size), dtype=jnp.float32)

    # PyTorch nn.GRU init convention: uniform(-1/sqrt(H), 1/sqrt(H)).
    bound = 1.0 / jnp.sqrt(jnp.float32(hidden_size))
    w_ih = jax.random.uniform(k3, (3 * hidden_size, input_size),
                              minval=-bound, maxval=bound, dtype=jnp.float32)
    w_hh = jax.random.uniform(k4, (3 * hidden_size, hidden_size),
                              minval=-bound, maxval=bound, dtype=jnp.float32)
    b_ih = jax.random.uniform(k5, (3 * hidden_size,),
                              minval=-bound, maxval=bound, dtype=jnp.float32)
    b_hh = jax.random.uniform(k6, (3 * hidden_size,),
                              minval=-bound, maxval=bound, dtype=jnp.float32)

    out = gru_forward(x, y, w_ih, w_hh, b_ih, b_hh)
    out = jax.block_until_ready(out)

    ref = gru_reference(x, y, w_ih, w_hh, b_ih, b_hh)
    assert out.shape == (B, N, hidden_size)
    assert jnp.allclose(out, ref, atol=1e-5, rtol=1e-5), "mismatch vs reference"
    print("KERNEL_OK")
</pallas_src>

<mosaic_0001>
module attributes {stable_mosaic.version = 11 : i64} {
  func.func @gru_cell_kernel(%arg0: i32, %arg1: memref<16x32xf32, #tpu.memory_space<vmem>>, %arg2: memref<16x32xf32, #tpu.memory_space<vmem>>, %arg3: memref<3x32x32xf32, #tpu.memory_space<vmem>>, %arg4: memref<3x32x32xf32, #tpu.memory_space<vmem>>, %arg5: memref<3x1x32xf32, #tpu.memory_space<vmem>>, %arg6: memref<3x1x32xf32, #tpu.memory_space<vmem>>, %arg7: memref<16x32xf32, #tpu.memory_space<vmem>>) attributes {dimension_semantics = [#tpu.dimension_semantics<parallel>], iteration_bounds = array<i64: 1>, scalar_prefetch = 0 : i64, scratch_operands = 0 : i64, tpu.core_type = #tpu.core_type<tc>, window_params = [{transform_indices = @transform_0, window_bounds = array<i64: 16, 32>}, {transform_indices = @transform_1, window_bounds = array<i64: 16, 32>}, {pipeline_mode = #tpu.pipeline_mode<synchronous>, transform_indices = @transform_2, window_bounds = array<i64: 3, 32, 32>}, {pipeline_mode = #tpu.pipeline_mode<synchronous>, transform_indices = @transform_3, window_bounds = array<i64: 3, 32, 32>}, {pipeline_mode = #tpu.pipeline_mode<synchronous>, transform_indices = @transform_4, window_bounds = array<i64: 3, 1, 32>}, {pipeline_mode = #tpu.pipeline_mode<synchronous>, transform_indices = @transform_5, window_bounds = array<i64: 3, 1, 32>}, {transform_indices = @transform_6, window_bounds = array<i64: 16, 32>}]} {
    %c0 = arith.constant 0 : index
    %c0_0 = arith.constant 0 : index
    %0 = vector.load %arg1[%c0, %c0_0] : memref<16x32xf32, #tpu.memory_space<vmem>>, vector<16x32xf32>
    %c0_1 = arith.constant 0 : index
    %c0_2 = arith.constant 0 : index
    %1 = vector.load %arg2[%c0_1, %c0_2] : memref<16x32xf32, #tpu.memory_space<vmem>>, vector<16x32xf32>
    %c0_3 = arith.constant 0 : index
    %c0_4 = arith.constant 0 : index
    %c0_5 = arith.constant 0 : index
    %2 = vector.load %arg3[%c0_3, %c0_4, %c0_5] : memref<3x32x32xf32, #tpu.memory_space<vmem>>, vector<1x32x32xf32>
    %3 = vector.shape_cast %2 : vector<1x32x32xf32> to vector<32x32xf32>
    %cst = arith.constant dense<0.000000e+00> : vector<16x32xf32>
    %4 = tpu.matmul %0, %3, %cst {dimension_numbers = #tpu.dot_dimension_numbers<[1], [0], [0], [1], [0, 0, 1, 1], [], []>} : vector<16x32xf32>, vector<32x32xf32>, vector<16x32xf32> -> vector<16x32xf32>
    %c1 = arith.constant 1 : index
    %c0_6 = arith.constant 0 : index
    %c0_7 = arith.constant 0 : index
    %5 = vector.load %arg3[%c1, %c0_6, %c0_7] : memref<3x32x32xf32, #tpu.memory_space<vmem>>, vector<1x32x32xf32>
    %6 = vector.shape_cast %5 : vector<1x32x32xf32> to vector<32x32xf32>
    %cst_8 = arith.constant dense<0.000000e+00> : vector<16x32xf32>
    %7 = tpu.matmul %0, %6, %cst_8 {dimension_numbers = #tpu.dot_dimension_numbers<[1], [0], [0], [1], [0, 0, 1, 1], [], []>} : vector<16x32xf32>, vector<32x32xf32>, vector<16x32xf32> -> vector<16x32xf32>
    %c2 = arith.constant 2 : index
    %c0_9 = arith.constant 0 : index
    %c0_10 = arith.constant 0 : index
    %8 = vector.load %arg3[%c2, %c0_9, %c0_10] : memref<3x32x32xf32, #tpu.memory_space<vmem>>, vector<1x32x32xf32>
    %9 = vector.shape_cast %8 : vector<1x32x32xf32> to vector<32x32xf32>
    %cst_11 = arith.constant dense<0.000000e+00> : vector<16x32xf32>
    %10 = tpu.matmul %0, %9, %cst_11 {dimension_numbers = #tpu.dot_dimension_numbers<[1], [0], [0], [1], [0, 0, 1, 1], [], []>} : vector<16x32xf32>, vector<32x32xf32>, vector<16x32xf32> -> vector<16x32xf32>
    %c0_12 = arith.constant 0 : index
    %c0_13 = arith.constant 0 : index
    %c0_14 = arith.constant 0 : index
    %11 = vector.load %arg4[%c0_12, %c0_13, %c0_14] : memref<3x32x32xf32, #tpu.memory_space<vmem>>, vector<1x32x32xf32>
    %12 = vector.shape_cast %11 : vector<1x32x32xf32> to vector<32x32xf32>
    %cst_15 = arith.constant dense<0.000000e+00> : vector<16x32xf32>
    %13 = tpu.matmul %1, %12, %cst_15 {dimension_numbers = #tpu.dot_dimension_numbers<[1], [0], [0], [1], [0, 0, 1, 1], [], []>} : vector<16x32xf32>, vector<32x32xf32>, vector<16x32xf32> -> vector<16x32xf32>
    %c1_16 = arith.constant 1 : index
    %c0_17 = arith.constant 0 : index
    %c0_18 = arith.constant 0 : index
    %14 = vector.load %arg4[%c1_16, %c0_17, %c0_18] : memref<3x32x32xf32, #tpu.memory_space<vmem>>, vector<1x32x32xf32>
    %15 = vector.shape_cast %14 : vector<1x32x32xf32> to vector<32x32xf32>
    %cst_19 = arith.constant dense<0.000000e+00> : vector<16x32xf32>
    %16 = tpu.matmul %1, %15, %cst_19 {dimension_numbers = #tpu.dot_dimension_numbers<[1], [0], [0], [1], [0, 0, 1, 1], [], []>} : vector<16x32xf32>, vector<32x32xf32>, vector<16x32xf32> -> vector<16x32xf32>
    %c2_20 = arith.constant 2 : index
    %c0_21 = arith.constant 0 : index
    %c0_22 = arith.constant 0 : index
    %17 = vector.load %arg4[%c2_20, %c0_21, %c0_22] : memref<3x32x32xf32, #tpu.memory_space<vmem>>, vector<1x32x32xf32>
    %18 = vector.shape_cast %17 : vector<1x32x32xf32> to vector<32x32xf32>
    %cst_23 = arith.constant dense<0.000000e+00> : vector<16x32xf32>
    %19 = tpu.matmul %1, %18, %cst_23 {dimension_numbers = #tpu.dot_dimension_numbers<[1], [0], [0], [1], [0, 0, 1, 1], [], []>} : vector<16x32xf32>, vector<32x32xf32>, vector<16x32xf32> -> vector<16x32xf32>
    %20 = arith.addf %4, %13 : vector<16x32xf32>
    %c0_24 = arith.constant 0 : index
    %c0_25 = arith.constant 0 : index
    %c0_26 = arith.constant 0 : index
    %21 = vector.load %arg5[%c0_24, %c0_25, %c0_26] : memref<3x1x32xf32, #tpu.memory_space<vmem>>, vector<1x1x32xf32>
    %22 = vector.shape_cast %21 : vector<1x1x32xf32> to vector<1x32xf32>
    %23 = vector.broadcast %22 : vector<1x32xf32> to vector<16x32xf32>
    %24 = arith.addf %20, %23 : vector<16x32xf32>
    %c0_27 = arith.constant 0 : index
    %c0_28 = arith.constant 0 : index
    %c0_29 = arith.constant 0 : index
    %25 = vector.load %arg6[%c0_27, %c0_28, %c0_29] : memref<3x1x32xf32, #tpu.memory_space<vmem>>, vector<1x1x32xf32>
    %26 = vector.shape_cast %25 : vector<1x1x32xf32> to vector<1x32xf32>
    %27 = vector.broadcast %26 : vector<1x32xf32> to vector<16x32xf32>
    %28 = arith.addf %24, %27 : vector<16x32xf32>
    %29 = arith.negf %28 : vector<16x32xf32>
    %30 = math.exp %29 : vector<16x32xf32>
    %cst_30 = arith.constant 1.000000e+00 : f32
    %31 = vector.broadcast %cst_30 : f32 to vector<16x32xf32>
    %32 = arith.addf %31, %30 : vector<16x32xf32>
    %33 = arith.divf %31, %32 : vector<16x32xf32>
    %34 = arith.addf %7, %16 : vector<16x32xf32>
    %c1_31 = arith.constant 1 : index
    %c0_32 = arith.constant 0 : index
    %c0_33 = arith.constant 0 : index
    %35 = vector.load %arg5[%c1_31, %c0_32, %c0_33] : memref<3x1x32xf32, #tpu.memory_space<vmem>>, vector<1x1x32xf32>
    %36 = vector.shape_cast %35 : vector<1x1x32xf32> to vector<1x32xf32>
    %37 = vector.broadcast %36 : vector<1x32xf32> to vector<16x32xf32>
    %38 = arith.addf %34, %37 : vector<16x32xf32>
    %c1_34 = arith.constant 1 : index
    %c0_35 = arith.constant 0 : index
    %c0_36 = arith.constant 0 : index
    %39 = vector.load %arg6[%c1_34, %c0_35, %c0_36] : memref<3x1x32xf32, #tpu.memory_space<vmem>>, vector<1x1x32xf32>
    %40 = vector.shape_cast %39 : vector<1x1x32xf32> to vector<1x32xf32>
    %41 = vector.broadcast %40 : vector<1x32xf32> to vector<16x32xf32>
    %42 = arith.addf %38, %41 : vector<16x32xf32>
    %43 = arith.negf %42 : vector<16x32xf32>
    %44 = math.exp %43 : vector<16x32xf32>
    %cst_37 = arith.constant 1.000000e+00 : f32
    %45 = vector.broadcast %cst_37 : f32 to vector<16x32xf32>
    %46 = arith.addf %45, %44 : vector<16x32xf32>
    %47 = arith.divf %45, %46 : vector<16x32xf32>
    %c2_38 = arith.constant 2 : index
    %c0_39 = arith.constant 0 : index
    %c0_40 = arith.constant 0 : index
    %48 = vector.load %arg5[%c2_38, %c0_39, %c0_40] : memref<3x1x32xf32, #tpu.memory_space<vmem>>, vector<1x1x32xf32>
    %49 = vector.shape_cast %48 : vector<1x1x32xf32> to vector<1x32xf32>
    %50 = vector.broadcast %49 : vector<1x32xf32> to vector<16x32xf32>
    %51 = arith.addf %10, %50 : vector<16x32xf32>
    %c2_41 = arith.constant 2 : index
    %c0_42 = arith.constant 0 : index
    %c0_43 = arith.constant 0 : index
    %52 = vector.load %arg6[%c2_41, %c0_42, %c0_43] : memref<3x1x32xf32, #tpu.memory_space<vmem>>, vector<1x1x32xf32>
    %53 = vector.shape_cast %52 : vector<1x1x32xf32> to vector<1x32xf32>
    %54 = vector.broadcast %53 : vector<1x32xf32> to vector<16x32xf32>
    %55 = arith.addf %19, %54 : vector<16x32xf32>
    %56 = arith.mulf %33, %55 : vector<16x32xf32>
    %57 = arith.addf %51, %56 : vector<16x32xf32>
    %58 = math.tanh %57 : vector<16x32xf32>
    %cst_44 = arith.constant 1.000000e+00 : f32
    %59 = vector.broadcast %cst_44 : f32 to vector<16x32xf32>
    %60 = arith.subf %59, %47 : vector<16x32xf32>
    %61 = arith.mulf %60, %58 : vector<16x32xf32>
    %62 = arith.mulf %47, %1 : vector<16x32xf32>
    %63 = arith.addf %61, %62 : vector<16x32xf32>
    %c0_45 = arith.constant 0 : index
    %c0_46 = arith.constant 0 : index
    %64 = vector.load %arg7[%c0_45, %c0_46] : memref<16x32xf32, #tpu.memory_space<vmem>>, vector<16x32xf32>
    tpu.vector_store %arg7[%c0_45, %c0_46], %63 {strides = array<i32>} : memref<16x32xf32, #tpu.memory_space<vmem>>, vector<16x32xf32>,
    return
  }
  func.func @transform_0(%arg0: i32) -> (i32, i32) {
    %c0_i32 = arith.constant 0 : i32
    %c0_i32_0 = arith.constant 0 : i32
    return %arg0, %c0_i32 : i32, i32
  }
  func.func @transform_1(%arg0: i32) -> (i32, i32) {
    %c0_i32 = arith.constant 0 : i32
    %c0_i32_0 = arith.constant 0 : i32
    return %arg0, %c0_i32 : i32, i32
  }
  func.func @transform_2(%arg0: i32) -> (i32, i32, i32) {
    %c0_i32 = arith.constant 0 : i32
    %c0_i32_0 = arith.constant 0 : i32
    %c0_i32_1 = arith.constant 0 : i32
    %c0_i32_2 = arith.constant 0 : i32
    return %c0_i32, %c0_i32_0, %c0_i32_1 : i32, i32, i32
  }
  func.func @transform_3(%arg0: i32) -> (i32, i32, i32) {
    %c0_i32 = arith.constant 0 : i32
    %c0_i32_0 = arith.constant 0 : i32
    %c0_i32_1 = arith.constant 0 : i32
    %c0_i32_2 = arith.constant 0 : i32
    return %c0_i32, %c0_i32_0, %c0_i32_1 : i32, i32, i32
  }
  func.func @transform_4(%arg0: i32) -> (i32, i32, i32) {
    %c0_i32 = arith.constant 0 : i32
    %c0_i32_0 = arith.constant 0 : i32
    %c0_i32_1 = arith.constant 0 : i32
    %c0_i32_2 = arith.constant 0 : i32
    return %c0_i32, %c0_i32_0, %c0_i32_1 : i32, i32, i32
  }
  func.func @transform_5(%arg0: i32) -> (i32, i32, i32) {
    %c0_i32 = arith.constant 0 : i32
    %c0_i32_0 = arith.constant 0 : i32
    %c0_i32_1 = arith.constant 0 : i32
    %c0_i32_2 = arith.constant 0 : i32
    return %c0_i32, %c0_i32_0, %c0_i32_1 : i32, i32, i32
  }
  func.func @transform_6(%arg0: i32) -> (i32, i32) {
    %c0_i32 = arith.constant 0 : i32
    %c0_i32_0 = arith.constant 0 : i32
    return %arg0, %c0_i32 : i32, i32
  }
}

</mosaic_0001>

<bundles_post_ra>
// kernel: gru_forward.1
= control target key start
LH: loop header
LB: loop body
LE: loop exit
PB: predicated region body
PF: predicated region fallthrough
CT: control target
= control target key end

     0   :  { %vm46_vm0 = vcmask 261120   ;;  %s1050_s0 = inlined_call_operand.vmem [shape: f32[16,32], index: 0, kind: input, shape index: {}]   ;;  %s1051_s1 = inlined_call_operand.vmem [shape: f32[16,32], index: 1, kind: input, shape index: {}]   ;;  %s1052_s2 = inlined_call_operand.vmem [shape: f32[3,32,32], index: 2, kind: input, shape index: {}]   ;;  %s1053_s3 = inlined_call_operand.vmem [shape: f32[3,32,32], index: 3, kind: input, shape index: {}]   ;;  %s1054_s4 = inlined_call_operand.vmem [shape: f32[3,1,32], index: 4, kind: input, shape index: {}]   ;;  %s1055_s5 = inlined_call_operand.vmem [shape: f32[3,1,32], index: 5, kind: input, shape index: {}]   ;;  %s1056_s6 = inlined_call_operand.hbm [shape: f32[16,32], index: 6, kind: output, shape index: {}]  }
   0x1   :  { %v42_v0 = vld [vmem:[%s1053_s3] sm:$0xff]  ;;  %v43_v1 = vld [vmem:[%s1053_s3 + $0x8] sm:$0xff]  ;;  %v44_v2 = vld [vmem:[%s1053_s3 + $0x10] sm:$0xff] }
   0x2   :  { %v773_v3 = vpack.c.bf16 %v43_v1, %v42_v0  ;;  %v45_v4 = vld [vmem:[%s1053_s3 + $0x18] sm:$0xff]  ;;  %v639_v5 = vld [vmem:[%s1053_s3 + $0x20] sm:$0xff]  ;;  %v640_v6 = vld [vmem:[%s1053_s3 + $0x28] sm:$0xff] }
   0x3   :  { %v777_v7 = vpack.c.bf16 %v45_v4, %v44_v2  ;;  %v781_v8 = vpack.c.bf16 %v640_v6, %v639_v5  ;;  %v931_v9 = vld [vmem:[%s1051_s1] sm:$0xff]  ;;  %v29_v11 = vld [vmem:[%s1052_s2 + $0x8] sm:$0xff]  ;;  %v641_v12 = vld [vmem:[%s1053_s3 + $0x30] sm:$0xff] }
   0x4   :  { %v28_v10 = vld [vmem:[%s1052_s2] sm:$0xff]  ;;  %774 = vmatprep.subr.bf16.mxu0 %v773_v3  ;;  %715 = vmatprep.mubr.msk.f32.mxu0 %vm46_vm0, %v931_v9  ;;  %v642_v13 = vld [vmem:[%s1053_s3 + $0x38] sm:$0xff]  ;;  %v630_v17 = vld [vmem:[%s1052_s2 + $0x28] sm:$0xff] }
   0x5   :  { %776 = vmatpush3.bf16.msra.mxu0 %v773_v3  ;;  %782 = vmatprep.subr.bf16.mxu1 %v781_v8  ;;  %v785_v14 = vpack.c.bf16 %v642_v13, %v641_v12  ;;  %v629_v15 = vld [vmem:[%s1052_s2 + $0x20] sm:$0xff]  ;;  %v789_v16 = vpack.c.bf16 %v29_v11, %v28_v10  ;;  %v30_v18 = vld [vmem:[%s1052_s2 + $0x10] sm:$0xff]  ;;  %v31_v19 = vld [vmem:[%s1052_s2 + $0x18] sm:$0xff] }
   0x6   :  { %778 = vmatprep.subr.bf16.mxu0 %v777_v7  ;;  %784 = vmatpush3.bf16.msra.mxu1 %v781_v8  ;;  %v797_v20 = vpack.c.bf16 %v630_v17, %v629_v15  ;;  %v631_v21 = vld [vmem:[%s1052_s2 + $0x30] sm:$0xff]  ;;  %v632_v22 = vld [vmem:[%s1052_s2 + $0x38] sm:$0xff]  ;;  %v970_v23 = vld [vmem:[%s1051_s1 + $0x8] sm:$0xff]  ;;  %v793_v24 = vpack.c.bf16 %v31_v19, %v30_v18 }
   0x7   :  { %786 = vmatprep.subr.bf16.mxu1 %v785_v14  ;;  %726 = vmatprep.mubr.msk.f32.mxu1 %vm46_vm0, %v931_v9 }
   0x9   :  { %780 = vmatpush3.bf16.msra.mxu0 %v777_v7 }
   0xa   :  { %790 = vmatprep.subr.bf16.mxu0 %v789_v16  ;;  %788 = vmatpush3.bf16.msra.mxu1 %v785_v14 }
   0xb   :  { %11 = vsyncpa [#allocation3], 0  ;;  %798 = vmatprep.subr.bf16.mxu1 %v797_v20  ;;  %v801_v25 = vpack.c.bf16 %v632_v22, %v631_v21  ;;  %v633_v26 = vld [vmem:[%s1052_s2 + $0x40] sm:$0xff]  ;;  %v634_v27 = vld [vmem:[%s1052_s2 + $0x48] sm:$0xff] }
   0xc   :  { %716 = vmatmul.mubr.msk.f32.vlgmr.msra.gmra.mrb[0].mxu0 %vm46_vm0, %v970_v23  ;;  %v24_v28 = vld [vmem:[%s1050_s0] sm:$0xff]  ;;  %v646_v30 = vld [vmem:[%s1053_s3 + $0x48] sm:$0xff]  ;;  %v805_v31 = vpack.c.bf16 %v634_v27, %v633_v26  ;;  %v635_v33 = vld [vmem:[%s1052_s2 + $0x50] sm:$0xff] }
   0xd   :  { %v645_v29 = vld [vmem:[%s1053_s3 + $0x40] sm:$0xff]  ;;  %792 = vmatpush3.bf16.msra.mxu0 %v789_v16  ;;  %727 = vmatmul.mubr.msk.f32.vlgmr.msra.gmra.mrb[0].mxu1 %vm46_vm0, %v970_v23  ;;  %v636_v34 = vld [vmem:[%s1052_s2 + $0x58] sm:$0xff]  ;;  %v647_v35 = vld [vmem:[%s1053_s3 + $0x50] sm:$0xff] }
   0xe   :  { %794 = vmatprep.subr.bf16.mxu0 %v793_v24  ;;  %800 = vmatpush3.bf16.msra.mxu1 %v797_v20  ;;  %v813_v32 = vpack.c.bf16 %v646_v30, %v645_v29  ;;  %v648_v36 = vld [vmem:[%s1053_s3 + $0x58] sm:$0xff]  ;;  %v25_v37 = vld [vmem:[%s1050_s0 + $0x8] sm:$0xff]  ;;  %v809_v38 = vpack.c.bf16 %v636_v34, %v635_v33  ;;  %v651_v40 = vld [vmem:[%s1054_s4] ss:$0 sm:$0xff] }
   0xf   :  { %737 = vmatprep.mubr.msk.f32.mxu0 %vm46_vm0, %v24_v28  ;;  %802 = vmatprep.subr.bf16.mxu1 %v801_v25  ;;  %v817_v39 = vpack.c.bf16 %v648_v36, %v647_v35  ;;  %v658_v41 = vld [vmem:[%s1054_s4 + $0x1] ss:$0 sm:$0xff]  ;;  %v652_v43 = vld [vmem:[%s1055_s5] ss:$0 sm:$0xff]  ;;  %v668_v5 = vld [vmem:[%s1055_s5 + $0x2] ss:$0 sm:$0xff] }
  0x10   :  { %748 = vmatprep.mubr.msk.f32.mxu1 %vm46_vm0, %v24_v28  ;;  %v660_v51 = vld [vmem:[%s1055_s5 + $0x1] ss:$0 sm:$0xff]  ;;  %v664_v7 = vld [vmem:[%s1054_s4 + $0x2] ss:$0 sm:$0xff]  ;;  %s872_s4 = smov [#allocation2]  }
  0x11   :  { %796 = vmatpush3.bf16.msra.mxu0 %v793_v24  ;;  %s618_s5 = sshll.u32 %s872_s4, 4  ;;  %s619_s5 = int_to_ptr.vmem [resolvable:$true] %s618_s5 }
  0x12   :  { %804 = vmatpush3.bf16.msra.mxu1 %v801_v25  ;;  %806 = vmatprep.subr.bf16.mxu0 %v805_v31  ;;  %s848_s13 = scalar_lea.vmem %s619_s5, 256  ;;  %p853_p1 = scmp.lt.s32.totalorder %s619_s5, %s619_s5 }
  0x13   :  { %814 = vmatprep.subr.bf16.mxu1 %v813_v32  ;;  %p849_p0 = scmp.ne.s32.totalorder %s619_s5, %s848_s13  ;;  %p854_p2 = scmp.lt.s32.totalorder %s848_s13, %s848_s13 }
  0x14   :  { %738 = vmatmul.mubr.msk.f32.vlgmr.msra.gmra.mrb[0].mxu0 %vm46_vm0, %v25_v37 }
  0x15   :  { %749 = vmatmul.mubr.msk.f32.vlgmr.msra.gmra.mrb[0].mxu1 %vm46_vm0, %v25_v37  ;;  %808 = vmatpush3.bf16.msra.mxu0 %v805_v31  ;;  %p855_p3 = por %p854_p2, %p853_p1 }
  0x16   :  { %816 = vmatpush3.bf16.msra.mxu1 %v813_v32  ;;  %810 = vmatprep.subr.bf16.mxu0 %v809_v38 }
  0x17   :  { %818 = vmatprep.subr.bf16.mxu1 %v817_v39  ;;  %770 = vmatprep.mubr.msk.f32.mxu1 %vm46_vm0, %v931_v9  ;;  %p856_p4 = pnand %p855_p3, %p849_p0 }
  0x18   :  { %759 = vmatprep.mubr.msk.f32.mxu0 %vm46_vm0, %v24_v28 }
  0x19   :  { %812 = vmatpush3.bf16.msra.mxu0 %v809_v38 }
  0x1a   :  { %820 = vmatpush3.bf16.msra.mxu1 %v817_v39 }
  0x1c   :  { %760 = vmatmul.mubr.msk.f32.vlgmr.msra.gmra.mrb[2].mxu0 %vm46_vm0, %v25_v37 }
  0x1d   :  { %771 = vmatmul.mubr.msk.f32.vlgmr.msra.gmra.mrb[2].mxu1 %vm46_vm0, %v970_v23 }
  0xe7   :  { %v739_v42 = vpop.f32.mrb[0].mxu0 }
  0xe8   :  { %v302_v44 = vadd.f32 %v739_v42, %v651_v40  ;;  %v285_v45 = vpop.f32.mrb[1].mxu0  ;;  %v750_v46 = vpop.f32.mrb[0].mxu1 }
  0xe9   :  { %v301_v47 = vadd.f32 %v651_v40, %v285_v45  ;;  %v408_v48 = vadd.f32 %v750_v46, %v658_v41  ;;  %v390_v49 = vpop.f32.mrb[1].mxu1 }
  0xea   :  { %v311_v50 = vadd.f32 %v652_v43, %v302_v44  ;;  %v407_v52 = vadd.f32 %v658_v41, %v390_v49 }
  0xeb   :  { %v310_v53 = vadd.f32 %v652_v43, %v301_v47  ;;  %v418_v56 = vadd.f32 %v660_v51, %v408_v48 }
  0xec   :  { %v654_v54 = vmul.f32 -1.442695, %v311_v50  ;;  %v417_v57 = vadd.f32 %v660_v51, %v407_v52 }
  0xed   :  { %v653_v55 = vmul.f32 -1.442695, %v310_v53  ;;  %v662_v61 = vmul.f32 -1.442695, %v418_v56 }
  0xee   :  { %828 = vpow2.f32 %v654_v54  ;;  %v661_v63 = vmul.f32 -1.442695, %v417_v57 }
  0xef   :  { %830 = vpow2.f32 %v653_v55  ;;  %v761_v58 = vpop.f32.mrb[2].mxu0 }
  0xf0   :  { %v772_v59 = vpop.f32.mrb[2].mxu1  ;;  %v505_v60 = vpop.f32.mrb[3].mxu0  ;;  %832 = vpow2.f32 %v662_v61  ;;  %v511_v13 = vadd.f32 %v761_v58, %v664_v7 }
  0xf1   :  { %v588_v62 = vpop.f32.mrb[3].mxu1  ;;  %834 = vpow2.f32 %v661_v63  ;;  %v594_v10 = vadd.f32 %v772_v59, %v668_v5  ;;  %v506_v15 = vadd.f32 %v664_v7, %v505_v60 }
  0xf2   :  { %v589_v12 = vadd.f32 %v668_v5, %v588_v62 }
  0xf8   :  { %v829_v0 = vpop.eup %828 }
  0xf9   :  { %v831_v1 = vpop.eup %830  ;;  %v319_v2 = vadd.f32 1.0, %v829_v0 }
  0xfa   :  { %v318_v3 = vadd.f32 1.0, %v831_v1  ;;  %v833_v4 = vpop.eup %832 }
  0xfb   :  { %836 = vrcp.f32 %v319_v2  ;;  %v835_v6 = vpop.eup %834  ;;  %v426_v8 = vadd.f32 1.0, %v833_v4 }
  0xfc   :  { %838 = vrcp.f32 %v318_v3  ;;  %v425_v11 = vadd.f32 1.0, %v835_v6 }
  0xfd   :  { %840 = vrcp.f32 %v426_v8 }
  0xfe   :  { %842 = vrcp.f32 %v425_v11 }
 0x105   :  { %v837_v14 = vpop.eup %836 }
 0x106   :  { %v839_v16 = vpop.eup %838  ;;  %v598_v17 = vmul.f32 %v837_v14, %v594_v10 }
 0x107   :  { %v597_v18 = vmul.f32 %v839_v16, %v589_v12  ;;  %v841_v21 = vpop.eup %840 }
 0x108   :  { %v600_v19 = vadd.f32 %v598_v17, %v511_v13  ;;  %v843_v22 = vpop.eup %842  ;;  %v604_v24 = vsub.f32 1.0, %v841_v21  ;;  %v608_v29 = vmul.f32 %v841_v21, %v970_v23 }
 0x109   :  { %v599_v20 = vadd.f32 %v597_v18, %v506_v15  ;;  %v603_v26 = vsub.f32 1.0, %v843_v22  ;;  %v607_v31 = vmul.f32 %v843_v22, %v931_v9 }
 0x10a   :  { %844 = vtanh.f32 %v600_v19 }
 0x10b   :  { %846 = vtanh.f32 %v599_v20 }
 0x114   :  { %v845_v25 = vpop.eup %844 }
 0x115   :  { %v847_v27 = vpop.eup %846  ;;  %v606_v28 = vmul.f32 %v845_v25, %v604_v24 }
 0x116   :  { %v605_v30 = vmul.f32 %v847_v27, %v603_v26 }
 0x117   :  { %v610_v32 = vadd.f32 %v608_v29, %v606_v28 }
 0x118   :  { %v609_v33 = vadd.f32 %v607_v31, %v605_v30 }
 0x119   :  { %612 = vst.msk [vmem:[#allocation2 + $0x8] sm:$0xff] %vm46_vm0, %v610_v32 }
 0x11a   :  { %611 = vst.msk [vmem:[#allocation2] sm:$0xff] %vm46_vm0, %v609_v33 }
 0x11b   :  { %859 = shalt.err (!%p856_p4)
}
 0x11c   :  { %s860_s15 = scalar_lea.hbm %s1056_s6, 256 }
 0x11d   :  { %p861_p5 = scmp.ne.s32.totalorder %s1056_s6, %s860_s15  ;;  %p864_p6 = scmp.lt.u32.totalorder %s860_s15, %s1056_s6 }
 0x11f   :  { %p866_p7 = pnand %p864_p6, %p861_p5 }
 0x121   :  { %869 = shalt.err (!%p866_p7)
}
 0x122   :  { %s873_s20 = smov 128   ;;  %s874_s21 = smov 8  }
 0x123   :  { %624 = dma.vmem_to_hbm [thread:$0]  %s619_s5, 256, %s1056_s6, [#allocation3], %s873_s20, %s873_s20, %s874_s21  }
 0x124   :  { %870 = dma.done.wait [#allocation3], 256  }
 0x125   :  { %871 = vsyncadd [#allocation3], 4294967040 }
 0x126   :  { %628 = vsyncpa [#allocation3], 1 }

</bundles_post_ra>
